<compile_context>
chip_gen: v6e
topology: v6e:2x2x1
jax: 0.10.0
libtpu: 0.0.40
codegen_flags: <defaults>
</compile_context>

<pallas_src>
import jax
import jax.numpy as jnp
from jax.experimental import pallas as pl
from jax.experimental.pallas import tpu as pltpu

HIDDEN = 512


def _round_up(x, m):
    return ((x + m - 1) // m) * m


def _cdiv(a, b):
    return -(-a // b)


def _choose_batch_tile(B, max_tile_b=512):
    """Balanced, sublane-aligned batch tiles; prefer an even tile count (2 v7x TCs)."""
    n_tiles = max(1, _cdiv(B, max_tile_b))
    if B >= 16 and n_tiles < 2:
        n_tiles = 2                       # give both v7x cores work
    if n_tiles > 1 and n_tiles % 2 == 1:
        n_tiles += 1                      # keep the grid even across 2 cores
    tb = _round_up(_cdiv(B, n_tiles), 8)  # sublane-aligned, padding <= ~7 rows
    n_tiles = _cdiv(B, tb)
    return tb, n_tiles


def _vmem_physical_bytes():
    try:
        return int(pltpu.get_tpu_info().vmem_capacity_bytes)
    except Exception:
        return 64 * 1024 * 1024           # conservative fallback: v7x per-TC VMEM


def _mlp_kernel(x_ref, w1_ref, b1_ref, w2_ref, b2_ref, o_ref):
    # x_ref:  [TB, D]   f32  (batch-tiled; bf16 cast happens here, not in XLA)
    # w1_ref: [D, 512]  bf16 (resident: constant index_map)
    # b1_ref: [1, 512]  f32
    # w2_ref: [512, Op] bf16 (resident; Op = 128-padded, MXU operand only)
    # b2_ref: [1, O]    f32  (unpadded)
    # o_ref:  [TB, O]   f32  (unpadded output block -> tiny writeback DMA)
    x_bf = x_ref[...].astype(jnp.bfloat16)
    h = jnp.dot(x_bf, w1_ref[...], preferred_element_type=jnp.float32)   # MXU, f32 accum
    h = jnp.maximum(h + b1_ref[...], 0.0)                                # bias + ReLU (VPU, f32)
    y = jnp.dot(h.astype(jnp.bfloat16), w2_ref[...],
                preferred_element_type=jnp.float32)                      # MXU
    o = o_ref.shape[1]
    o_ref[...] = (y[:, :o] + b2_ref[...]).astype(o_ref.dtype)
    # TODO(synk): on v5e (MXU-bound) with O<=8, replace the second dot with a
    # VPU broadcast-multiply + lane-sum per output column to skip padded flops.


def prepare_params(w1, b1, w2, b2):
    """One-time layout plumbing (hoisted out of the per-call path).

    w1: [D, 512], b1: [512], w2: [512, O], b2: [O]
    Returns (w1_bf16, b1_2d_f32, w2_padded_bf16, b2_2d_f32).
    """
    D, H = w1.shape
    H2, O = w2.shape
    assert H == HIDDEN and H2 == HIDDEN and b1.shape == (HIDDEN,) and b2.shape == (O,)
    Op = _round_up(O, 128)                        # lane-dense MXU operand only
    w1_b = w1.astype(jnp.bfloat16)
    w2_p = jnp.zeros((HIDDEN, Op), jnp.bfloat16).at[:, :O].set(w2.astype(jnp.bfloat16))
    b1_2d = b1.reshape(1, HIDDEN).astype(jnp.float32)
    b2_2d = b2.reshape(1, O).astype(jnp.float32)
    return w1_b, b1_2d, w2_p, b2_2d


def activity_prediction_forward(x, w1_b, b1_2d, w2_p, b2_2d, *, max_tile_b=512):
    """x: [B, D] f32; params from prepare_params(). Returns [B, O] f32."""
    B, D = x.shape
    O = b2_2d.shape[1]
    Op = w2_p.shape[1]
    assert w1_b.shape == (D, HIDDEN)

    TB, n_tiles = _choose_batch_tile(B, max_tile_b)
    Bp = TB * n_tiles
    x_in = jnp.pad(x, ((0, Bp - B), (0, 0))) if Bp != B else x   # minimal row pad only

    # VMEM budget: double-buffered x/out blocks, double-buffered resident
    # weights (default pipelining), plus compiler-materialized intermediates.
    vmem_bytes = (
        2 * TB * max(D, 128) * 4        # x blocks (f32)
        + 2 * D * HIDDEN * 2            # w1 (bf16), resident but double-buffered
        + 2 * HIDDEN * 4                # b1 (f32)
        + 2 * HIDDEN * Op * 2           # w2 (bf16)
        + 2 * 8 * 128 * 4               # b2 (f32, one padded tile)
        + 2 * TB * 128 * 4              # out blocks (f32, lane-padded layout)
        + TB * HIDDEN * 4               # h (f32)
        + TB * HIDDEN * 2               # h bf16 repack
        + TB * 128 * 4                  # y (f32)
        + TB * max(D, 128) * 2          # x bf16 cast
    )
    vmem_limit = int(min(max(vmem_bytes + (8 << 20), 16 << 20),
                         (_vmem_physical_bytes() * 3) // 4))

    out = pl.pallas_call(
        _mlp_kernel,
        out_shape=jax.ShapeDtypeStruct((Bp, O), jnp.float32),
        grid=(n_tiles,),
        in_specs=[
            pl.BlockSpec((TB, D), lambda i: (i, 0)),          # x: tiled over batch, full D
            pl.BlockSpec((D, HIDDEN), lambda i: (0, 0)),      # w1: resident
            pl.BlockSpec((1, HIDDEN), lambda i: (0, 0)),      # b1: resident
            pl.BlockSpec((HIDDEN, Op), lambda i: (0, 0)),     # w2: resident (lane-padded)
            pl.BlockSpec((1, O), lambda i: (0, 0)),           # b2: resident, unpadded
        ],
        out_specs=pl.BlockSpec((TB, O), lambda i: (i, 0)),    # unpadded O columns
        compiler_params=pltpu.CompilerParams(
            dimension_semantics=("parallel",),
            vmem_limit_bytes=vmem_limit,
        ),
    )(x_in, w1_b, b1_2d, w2_p, b2_2d)

    return out[:B] if Bp != B else out
    # TODO(synk): if D*512 weights ever exceed the VMEM budget, add a K-grid
    # axis over D with a VMEM f32 accumulator + pl.when init/finalize; on v7x,
    # pipeline_mode=pl.Buffered(1) on the constant weight specs would also
    # halve their resident footprint.


def init_params(key, input_dim, output_dim=1):
    """Deterministic init mirroring nn.Linear shapes (stored transposed as [in, out])."""
    k1, k2, k3, k4 = jax.random.split(key, 4)
    lim1 = 1.0 / jnp.sqrt(input_dim)
    lim2 = 1.0 / jnp.sqrt(HIDDEN)
    w1 = jax.random.uniform(k1, (input_dim, HIDDEN), jnp.float32, -lim1, lim1)
    b1 = jax.random.uniform(k2, (HIDDEN,), jnp.float32, -lim1, lim1)
    w2 = jax.random.uniform(k3, (HIDDEN, output_dim), jnp.float32, -lim2, lim2)
    b2 = jax.random.uniform(k4, (output_dim,), jnp.float32, -lim2, lim2)
    return w1, b1, w2, b2


def _reference(x, w1, b1, w2, b2):
    return jnp.maximum(x @ w1 + b1, 0.0) @ w2 + b2


if __name__ == "__main__":
    key = jax.random.PRNGKey(0)
    k_x, k_p, k_x2, k_p2 = jax.random.split(key, 4)

    fwd = jax.jit(activity_prediction_forward)

    # Small case matching the module's typical use (O=1 regression head).
    batch, input_dim, output_dim = 8, 32, 1
    x = jax.random.normal(k_x, (batch, input_dim), jnp.float32)
    params = init_params(k_p, input_dim, output_dim)
    prepared = prepare_params(*params)                 # one-time weight plumbing
    out = jax.block_until_ready(fwd(x, *prepared))
    ref = _reference(x, *params)
    assert out.shape == (batch, output_dim)
    # bf16 MXU operands -> loosened tolerance vs f32 reference.
    assert jnp.allclose(out, ref, atol=2e-2, rtol=2e-2)

    # Second case: multiple grid steps, D/O not multiples of 128.
    batch2, input_dim2, output_dim2 = 1024, 96, 3
    x2 = jax.random.normal(k_x2, (batch2, input_dim2), jnp.float32)
    params2 = init_params(k_p2, input_dim2, output_dim2)
    prepared2 = prepare_params(*params2)
    out2 = jax.block_until_ready(fwd(x2, *prepared2))
    ref2 = _reference(x2, *params2)
    assert out2.shape == (batch2, output_dim2)
    assert jnp.allclose(out2, ref2, atol=2e-2, rtol=2e-2)

    print("KERNEL_OK")
</pallas_src>

<mosaic_0001>
module attributes {stable_mosaic.version = 11 : i64} {
  func.func @_mlp_kernel(%arg0: i32, %arg1: memref<8x32xf32, #tpu.memory_space<vmem>>, %arg2: memref<32x512xbf16, #tpu.memory_space<vmem>>, %arg3: memref<1x512xf32, #tpu.memory_space<vmem>>, %arg4: memref<512x128xbf16, #tpu.memory_space<vmem>>, %arg5: memref<1x1xf32, #tpu.memory_space<vmem>>, %arg6: memref<8x1xf32, #tpu.memory_space<vmem>>) attributes {dimension_semantics = [#tpu.dimension_semantics<parallel>], iteration_bounds = array<i64: 1>, scalar_prefetch = 0 : i64, scratch_operands = 0 : i64, tpu.core_type = #tpu.core_type<tc>, window_params = [{transform_indices = @transform_0, window_bounds = array<i64: 8, 32>}, {pipeline_mode = #tpu.pipeline_mode<synchronous>, transform_indices = @transform_1, window_bounds = array<i64: 32, 512>}, {pipeline_mode = #tpu.pipeline_mode<synchronous>, transform_indices = @transform_2, window_bounds = array<i64: 1, 512>}, {pipeline_mode = #tpu.pipeline_mode<synchronous>, transform_indices = @transform_3, window_bounds = array<i64: 512, 128>}, {pipeline_mode = #tpu.pipeline_mode<synchronous>, transform_indices = @transform_4, window_bounds = array<i64: 1, 1>}, {transform_indices = @transform_5, window_bounds = array<i64: 8, 1>}]} {
    %c0 = arith.constant 0 : index
    %c0_0 = arith.constant 0 : index
    %0 = vector.load %arg1[%c0, %c0_0] : memref<8x32xf32, #tpu.memory_space<vmem>>, vector<8x32xf32>
    %1 = arith.truncf %0 : vector<8x32xf32> to vector<8x32xbf16>
    %c0_1 = arith.constant 0 : index
    %c0_2 = arith.constant 0 : index
    %2 = vector.load %arg2[%c0_1, %c0_2] : memref<32x512xbf16, #tpu.memory_space<vmem>>, vector<32x512xbf16>
    %cst = arith.constant dense<0.000000e+00> : vector<8x512xf32>
    %3 = tpu.matmul %1, %2, %cst {dimension_numbers = #tpu.dot_dimension_numbers<[1], [0], [0], [1], [0, 0, 1, 1], [], []>} : vector<8x32xbf16>, vector<32x512xbf16>, vector<8x512xf32> -> vector<8x512xf32>
    %c0_3 = arith.constant 0 : index
    %c0_4 = arith.constant 0 : index
    %4 = vector.load %arg3[%c0_3, %c0_4] : memref<1x512xf32, #tpu.memory_space<vmem>>, vector<1x512xf32>
    %5 = vector.broadcast %4 : vector<1x512xf32> to vector<8x512xf32>
    %6 = arith.addf %3, %5 : vector<8x512xf32>
    %cst_5 = arith.constant 0.000000e+00 : f32
    %7 = vector.broadcast %cst_5 : f32 to vector<8x512xf32>
    %8 = arith.maximumf %6, %7 : vector<8x512xf32>
    %9 = arith.truncf %8 : vector<8x512xf32> to vector<8x512xbf16>
    %c0_6 = arith.constant 0 : index
    %c0_7 = arith.constant 0 : index
    %10 = vector.load %arg4[%c0_6, %c0_7] : memref<512x128xbf16, #tpu.memory_space<vmem>>, vector<512x128xbf16>
    %cst_8 = arith.constant dense<0.000000e+00> : vector<8x128xf32>
    %11 = tpu.matmul %9, %10, %cst_8 {dimension_numbers = #tpu.dot_dimension_numbers<[1], [0], [0], [1], [0, 0, 1, 1], [], []>} : vector<8x512xbf16>, vector<512x128xbf16>, vector<8x128xf32> -> vector<8x128xf32>
    %12 = vector.extract_strided_slice %11 {offsets = [0, 0], sizes = [8, 1], strides = [1, 1]} : vector<8x128xf32> to vector<8x1xf32>
    %c0_9 = arith.constant 0 : index
    %c0_10 = arith.constant 0 : index
    %13 = vector.load %arg5[%c0_9, %c0_10] : memref<1x1xf32, #tpu.memory_space<vmem>>, vector<1x1xf32>
    %14 = vector.broadcast %13 : vector<1x1xf32> to vector<8x1xf32>
    %15 = arith.addf %12, %14 : vector<8x1xf32>
    %c0_11 = arith.constant 0 : index
    %c0_12 = arith.constant 0 : index
    %16 = vector.load %arg6[%c0_11, %c0_12] : memref<8x1xf32, #tpu.memory_space<vmem>>, vector<8x1xf32>
    tpu.vector_store %arg6[%c0_11, %c0_12], %15 {strides = array<i32>} : memref<8x1xf32, #tpu.memory_space<vmem>>, vector<8x1xf32>,
    return
  }
  func.func @transform_0(%arg0: i32) -> (i32, i32) {
    %c0_i32 = arith.constant 0 : i32
    %c0_i32_0 = arith.constant 0 : i32
    return %arg0, %c0_i32 : i32, i32
  }
  func.func @transform_1(%arg0: i32) -> (i32, i32) {
    %c0_i32 = arith.constant 0 : i32
    %c0_i32_0 = arith.constant 0 : i32
    %c0_i32_1 = arith.constant 0 : i32
    return %c0_i32, %c0_i32_0 : i32, i32
  }
  func.func @transform_2(%arg0: i32) -> (i32, i32) {
    %c0_i32 = arith.constant 0 : i32
    %c0_i32_0 = arith.constant 0 : i32
    %c0_i32_1 = arith.constant 0 : i32
    return %c0_i32, %c0_i32_0 : i32, i32
  }
  func.func @transform_3(%arg0: i32) -> (i32, i32) {
    %c0_i32 = arith.constant 0 : i32
    %c0_i32_0 = arith.constant 0 : i32
    %c0_i32_1 = arith.constant 0 : i32
    return %c0_i32, %c0_i32_0 : i32, i32
  }
  func.func @transform_4(%arg0: i32) -> (i32, i32) {
    %c0_i32 = arith.constant 0 : i32
    %c0_i32_0 = arith.constant 0 : i32
    %c0_i32_1 = arith.constant 0 : i32
    return %c0_i32, %c0_i32_0 : i32, i32
  }
  func.func @transform_5(%arg0: i32) -> (i32, i32) {
    %c0_i32 = arith.constant 0 : i32
    %c0_i32_0 = arith.constant 0 : i32
    return %arg0, %c0_i32 : i32, i32
  }
}

</mosaic_0001>

<bundles_post_ra>
// kernel: activity_prediction_forward.1
= control target key start
LH: loop header
LB: loop body
LE: loop exit
PB: predicated region body
PF: predicated region fallthrough
CT: control target
= control target key end

     0   :  { %s839_s0 = inlined_call_operand.hbm [shape: f32[8,32], index: 0, kind: input, shape index: {}]   ;;  %s840_s1 = inlined_call_operand.hbm [shape: bf16[32,512], index: 1, kind: input, shape index: {}]   ;;  %s841_s2 = inlined_call_operand.vmem [shape: f32[1,512], index: 2, kind: input, shape index: {}]   ;;  %s842_s3 = inlined_call_operand.hbm [shape: bf16[512,128], index: 3, kind: input, shape index: {}]   ;;  %s843_s4 = inlined_call_operand.<no memory space> [shape: f32[1,1], index: 4, kind: input, shape index: {}]   ;;  %s844_s5 = inlined_call_operand.vmem [shape: f32[8,1], index: 5, kind: output, shape index: {}]  }
   0x1   :  { %v10_v0 = vstv %s843_s4 }
   0x2   :  { %11 = vst [vmem:[#allocation2] sm:$0x1] %v10_v0 }
   0x3   :  { %12 = vsyncpa [#allocation4], 0 }
   0x4   :  { %13 = vsyncpa [#allocation6], 0  ;;  %s783_s20 = smov [#allocation5]  }
   0x5   :  { %s29_s21 = sshll.u32 %s783_s20, 4  ;;  %s30_s21 = int_to_ptr.vmem [resolvable:$true] %s29_s21 }
   0x6   :  { %s727_s22 = scalar_lea.vmem %s30_s21, 1024  ;;  %p732_p1 = scmp.lt.s32.totalorder %s30_s21, %s30_s21 }
   0x7   :  { %p728_p0 = scmp.ne.s32.totalorder %s30_s21, %s727_s22  ;;  %p733_p2 = scmp.lt.s32.totalorder %s727_s22, %s727_s22 }
   0x9   :  { %p734_p3 = por %p733_p2, %p732_p1 }
   0xb   :  { %p735_p4 = pnand %p734_p3, %p728_p0 }
   0xd   :  { %738 = shalt.err (!%p735_p4)
}
   0xe   :  { %s784_s23 = smov 256   ;;  %s785_s24 = smov 16  }
   0xf   :  { %35 = dma.hbm_to_vmem [thread:$0]  %s840_s1, 1024, %s30_s21, [#allocation6], %s784_s23, %s784_s23, %s785_s24  }
  0x10   :  { %s786_s4 = smov [#allocation3]   ;;  %s787_s28 = smov [#allocation7]  }
  0x11   :  { %s20_s27 = sshll.u32 %s786_s4, 4  ;;  %s43_s29 = sshll.u32 %s787_s28, 4  ;;  %s21_s27 = int_to_ptr.vmem [resolvable:$true] %s20_s27  ;;  %s44_s29 = int_to_ptr.vmem [resolvable:$true] %s43_s29 }
  0x12   :  { %s747_s30 = scalar_lea.vmem %s21_s27, 128  ;;  %p752_p6 = scmp.lt.s32.totalorder %s21_s27, %s21_s27 }
  0x13   :  { %p748_p5 = scmp.ne.s32.totalorder %s21_s27, %s747_s30  ;;  %p753_p7 = scmp.lt.s32.totalorder %s747_s30, %s747_s30 }
  0x15   :  { %p754_p8 = por %p753_p7, %p752_p6 }
  0x17   :  { %p755_p9 = pnand %p754_p8, %p748_p5 }
  0x19   :  { %758 = shalt.err (!%p755_p9)
}
  0x1a   :  { %23 = dma.hbm_to_vmem [thread:$0]  %s839_s0, 128, %s21_s27, [#allocation4]  }
  0x1b   :  { %s767_s8 = scalar_lea.vmem %s44_s29, 4096  ;;  %p772_p11 = scmp.lt.s32.totalorder %s44_s29, %s44_s29 }
  0x1c   :  { %p768_p10 = scmp.ne.s32.totalorder %s44_s29, %s767_s8  ;;  %p773_p12 = scmp.lt.s32.totalorder %s767_s8, %s767_s8 }
  0x1e   :  { %p774_p13 = por %p773_p12, %p772_p11 }
  0x20   :  { %p775_p0 = pnand %p774_p13, %p768_p10 }
  0x22   :  { %778 = shalt.err (!%p775_p0)
}
  0x23   :  { %s788_s1 = smov 64   ;;  %s789_s9 = smov 4  }
  0x24   :  { %49 = dma.hbm_to_vmem [thread:$0]  %s842_s3, 4096, %s44_s29, [#allocation6], %s788_s1, %s788_s1, %s789_s9  }
  0x25   :  { %779 = dma.done.wait [#allocation4], 128  }
  0x26   :  { %780 = vsyncadd [#allocation4], 4294967168 }
  0x27   :  { %781 = dma.done.wait [#allocation6], 5120  }
  0x28   :  { %782 = vsyncadd [#allocation6], 4294962176  ;;  %v790_v1 = vmov 0   ;;  %v675_v2 = vld [vmem:[#allocation5 + $0x24] ss:$16 sps:$4 sm:$0xff]   ;;  %v62_v10 = vld [vmem:[#allocation3] sm:$0xff]  ;;  %v74_v44 = vlaneseq }
  0x29   :  { %170 = vmatprep.mubr.bf16.mxu0 %v790_v1  ;;  %211 = vmatprep.mubr.bf16.mxu1 %v790_v1  ;;  %v677_v3 = vld [vmem:[#allocation5 + $0x2c] ss:$16 sps:$4 sm:$0xff]   ;;  %v679_v4 = vld [vmem:[#allocation5 + $0x20] ss:$16 sps:$4 sm:$0xff]   ;;  %v680_v5 = vld [vmem:[#allocation5 + $0x28] ss:$16 sps:$4 sm:$0xff]   ;;  %v63_v12 = vpack.c.bf16 %v62_v10, %v62_v10 }
  0x2a   :  { %150 = vmatprep.subr.bf16.mxu0 %v675_v2  ;;  %191 = vmatprep.subr.bf16.mxu1 %v677_v3  ;;  %v681_v6 = vld [vmem:[#allocation5 + $0x4] ss:$16 sps:$4 sm:$0xff]   ;;  %v683_v7 = vld [vmem:[#allocation5 + $0xc] ss:$16 sps:$4 sm:$0xff]   ;;  %v685_v8 = vld [vmem:[#allocation5] ss:$16 sps:$4 sm:$0xff]  }
  0x2b   :  { %151 = vmatpush1.bf16.msra.mxu0 %v679_v4  ;;  %192 = vmatpush1.bf16.msra.mxu1 %v680_v5  ;;  %v686_v9 = vld [vmem:[#allocation5 + $0x8] ss:$16 sps:$4 sm:$0xff]   ;;  %vm134_vm0 = vcmask 261120   ;;  %v691_v16 = vld [vmem:[#allocation7 + $0x70] sm:$0xff]   ;;  %v699_v24 = vld [vmem:[#allocation7 + $0x60] sm:$0xff]   ;;  %v75_v45 = vshrl.u32 %v74_v44, 7 }
  0x2c   :  { %152 = vmatprep.subr.bf16.mxu0 %v681_v6  ;;  %193 = vmatprep.subr.bf16.mxu1 %v683_v7  ;;  %v687_v11 = vld [vmem:[#allocation7 + $0x78] sm:$0xff]   ;;  %v692_v17 = vld [vmem:[#allocation7 + $0xf0] sm:$0xff]   ;;  %v695_v20 = vld [vmem:[#allocation7 + $0x68] sm:$0xff]   ;;  %vm572_vm1 = vcmask 7168  }
  0x2d   :  { %v688_v13 = vld [vmem:[#allocation7 + $0xf8] sm:$0xff]   ;;  %v693_v18 = vld [vmem:[#allocation7 + $0x30] sm:$0xff]   ;;  %v696_v21 = vld [vmem:[#allocation7 + $0xe8] sm:$0xff]   ;;  %v76_v46 = vsub.s32 0, %v75_v45  ;;  %v84_v47 = vsub.s32 2, %v75_v45  ;;  %v80_v49 = vsub.s32 1, %v75_v45 }
  0x2e   :  { %v689_v14 = vld [vmem:[#allocation7 + $0x38] sm:$0xff]   ;;  %v694_v19 = vld [vmem:[#allocation7 + $0xb0] sm:$0xff]   ;;  %v697_v22 = vld [vmem:[#allocation7 + $0x28] sm:$0xff]   ;;  %v88_v50 = vsub.s32 3, %v75_v45 }
  0x2f   :  { %153 = vmatpush1.bf16.msra.mxu0 %v685_v8  ;;  %194 = vmatpush1.bf16.msra.mxu1 %v686_v9  ;;  %v690_v15 = vld [vmem:[#allocation7 + $0xb8] sm:$0xff]   ;;  %v698_v23 = vld [vmem:[#allocation7 + $0xa8] sm:$0xff]   ;;  %v700_v25 = vld [vmem:[#allocation7 + $0xe0] sm:$0xff]  }
  0x30   :  { %623 = vmatprep.subr.bf16.mxu0 %v687_v11  ;;  %645 = vmatprep.subr.bf16.mxu1 %v688_v13  ;;  %v701_v26 = vld [vmem:[#allocation7 + $0x20] sm:$0xff]   ;;  %v703_v28 = vld [vmem:[#allocation7 + $0x58] sm:$0xff]   ;;  %v707_v32 = vld [vmem:[#allocation7 + $0x50] sm:$0xff]  }
  0x31   :  { %v702_v27 = vld [vmem:[#allocation7 + $0xa0] sm:$0xff]   ;;  %v704_v29 = vld [vmem:[#allocation7 + $0xd8] sm:$0xff]   ;;  %v708_v33 = vld [vmem:[#allocation7 + $0xd0] sm:$0xff]  }
  0x32   :  { %588 = vmatmul.mubr.msk.bf16.vlgmr.msra.gmra.mxu0 %vm134_vm0, %v63_v12  ;;  %589 = vmatmul.mubr.msk.bf16.vlgmr.msra.gmra.mxu1 %vm134_vm0, %v63_v12  ;;  %v705_v30 = vld [vmem:[#allocation7 + $0x18] sm:$0xff]   ;;  %v709_v34 = vld [vmem:[#allocation7 + $0x10] sm:$0xff]   ;;  %v711_v36 = vld [vmem:[#allocation7 + $0x48] sm:$0xff]  }
  0x33   :  { %624 = vmatpush3.bf16.msra.mxu0 %v689_v14  ;;  %646 = vmatpush3.bf16.msra.mxu1 %v690_v15  ;;  %v706_v31 = vld [vmem:[#allocation7 + $0x98] sm:$0xff]   ;;  %v710_v35 = vld [vmem:[#allocation7 + $0x90] sm:$0xff]   ;;  %v712_v37 = vld [vmem:[#allocation7 + $0xc8] sm:$0xff]  }
  0x34   :  { %625 = vmatprep.subr.bf16.mxu0 %v691_v16  ;;  %647 = vmatprep.subr.bf16.mxu1 %v692_v17  ;;  %v713_v38 = vld [vmem:[#allocation7 + $0x8] sm:$0xff]   ;;  %v715_v40 = vld [vmem:[#allocation7 + $0x40] sm:$0xff]   ;;  %v72_v48 = vld [vmem:[%s841_s2] sm:$0xf] }
  0x35   :  { %v714_v39 = vld [vmem:[#allocation7 + $0x88] sm:$0xff]   ;;  %v716_v41 = vld [vmem:[#allocation7 + $0xc0] sm:$0xff]   ;;  %v77_v51 = vrot.slane %v72_v48, %v76_v46  ;;  %v85_v52 = vrot.slane %v72_v48, %v84_v47  ;;  %v81_v53 = vrot.slane %v72_v48, %v80_v49  ;;  %v89_v54 = vrot.slane %v72_v48, %v88_v50  ;;  %v622_v17 = vld [vmem:[#allocation2] ss:$0 sm:$0xff] }
  0x36   :  { %v717_v42 = vld [vmem:[#allocation7] sm:$0xff]  }
  0x37   :  { %626 = vmatpush3.bf16.msra.mxu0 %v693_v18  ;;  %648 = vmatpush3.bf16.msra.mxu1 %v694_v19  ;;  %v718_v43 = vld [vmem:[#allocation7 + $0x80] sm:$0xff]  }
  0x38   :  { %627 = vmatprep.subr.bf16.mxu0 %v695_v20  ;;  %649 = vmatprep.subr.bf16.mxu1 %v696_v21 }
  0x3b   :  { %628 = vmatpush3.bf16.msra.mxu0 %v697_v22  ;;  %650 = vmatpush3.bf16.msra.mxu1 %v698_v23 }
  0x3c   :  { %629 = vmatprep.subr.bf16.mxu0 %v699_v24  ;;  %651 = vmatprep.subr.bf16.mxu1 %v700_v25 }
  0x3f   :  { %630 = vmatpush3.bf16.msra.mxu0 %v701_v26  ;;  %652 = vmatpush3.bf16.msra.mxu1 %v702_v27 }
  0x40   :  { %631 = vmatprep.subr.bf16.mxu0 %v703_v28  ;;  %653 = vmatprep.subr.bf16.mxu1 %v704_v29 }
  0x43   :  { %632 = vmatpush3.bf16.msra.mxu0 %v705_v30  ;;  %654 = vmatpush3.bf16.msra.mxu1 %v706_v31 }
  0x44   :  { %633 = vmatprep.subr.bf16.mxu0 %v707_v32  ;;  %655 = vmatprep.subr.bf16.mxu1 %v708_v33 }
  0x47   :  { %634 = vmatpush3.bf16.msra.mxu0 %v709_v34  ;;  %656 = vmatpush3.bf16.msra.mxu1 %v710_v35 }
  0x48   :  { %635 = vmatprep.subr.bf16.mxu0 %v711_v36  ;;  %657 = vmatprep.subr.bf16.mxu1 %v712_v37 }
  0x4b   :  { %636 = vmatpush3.bf16.msra.mxu0 %v713_v38  ;;  %658 = vmatpush3.bf16.msra.mxu1 %v714_v39 }
  0x4c   :  { %637 = vmatprep.subr.bf16.mxu0 %v715_v40  ;;  %659 = vmatprep.subr.bf16.mxu1 %v716_v41 }
  0x4f   :  { %638 = vmatpush3.bf16.msra.mxu0 %v717_v42  ;;  %660 = vmatpush3.bf16.msra.mxu1 %v718_v43 }
  0xf2   :  { %v172_v55 = vpop.f32.mrf.mxu0  ;;  %v213_v56 = vpop.f32.mrf.mxu1 }
  0xf3   :  { %v173_v57 = vadd.f32 %v172_v55, %v77_v51  ;;  %v214_v58 = vadd.f32 %v213_v56, %v85_v52 }
  0xf4   :  { %v174_v59 = vpop.f32.mrf.mxu0  ;;  %v215_v60 = vpop.f32.mrf.mxu1 }
  0xf5   :  { %v175_v61 = vadd.f32 %v174_v59, %v81_v53  ;;  %v216_v62 = vadd.f32 %v215_v60, %v89_v54  ;;  %v220_v63 = vmax.f32 %v173_v57, 0.0  ;;  %v222_v0 = vmax.f32 %v214_v58, 0.0 }
  0xf6   :  { %v176_v1 = vpop.f32.mrf.mxu0  ;;  %v217_v2 = vpop.f32.mrf.mxu1 }
  0xf7   :  { %v221_v3 = vmax.f32 %v175_v61, 0.0  ;;  %v223_v4 = vmax.f32 %v216_v62, 0.0  ;;  %v224_v9 = vpack.c.bf16 %v220_v63, %v220_v63  ;;  %v226_v10 = vpack.c.bf16 %v222_v0, %v222_v0 }
  0xf8   :  { %v177_v5 = vpop.f32.mrf.mxu0  ;;  %v218_v6 = vpop.f32.mrf.mxu1 }
  0xf9   :  { %v225_v7 = vpack.c.bf16 %v221_v3, %v221_v3  ;;  %v227_v8 = vpack.c.bf16 %v223_v4, %v223_v4 }
  0xfb   :  { %516 = vmatprep.mubr.bf16.mxu0 %v225_v7  ;;  %556 = vmatprep.mubr.bf16.mxu1 %v227_v8 }
  0xfc   :  { %517 = vmatmul.mubr.bf16.vlgmr.msra.gmra.mxu0 %v224_v9  ;;  %557 = vmatmul.mubr.bf16.vlgmr.msra.gmra.mxu1 %v226_v10 }
 0x1bc   :  { %v639_v11 = vpop.f32.mrf.mxu0  ;;  %v661_v12 = vpop.f32.mrf.mxu1 }
 0x1be   :  { %v640_v13 = vpop.f32.mrf.mxu0  ;;  %v662_v14 = vpop.f32.mrf.mxu1 }
 0x1bf   :  { %v641_v15 = vadd.f32 %v640_v13, %v639_v11  ;;  %v663_v16 = vadd.f32 %v662_v14, %v661_v12 }
 0x1c0   :  { %v642_v18 = vpop.f32.mrf.mxu0  ;;  %v664_v19 = vpop.f32.mrf.mxu1 }
 0x1c1   :  { %v559_v20 = vadd.f32 %v663_v16, %v641_v15 }
 0x1c2   :  { %v643_v21 = vpop.f32.mrf.mxu0  ;;  %v665_v22 = vpop.f32.mrf.mxu1 }
 0x1c3   :  { %v571_v23 = vadd.f32 %v622_v17, %v559_v20 }
 0x1c5   :  { %573 = vst.msk [vmem:[%s844_s5] sm:$0xff] %vm572_vm1, %v571_v23 }
 0x1c6   :  { %578 = vsyncpa [#allocation4], 1 }
 0x1c7   :  { %579 = vsyncpa [#allocation6], 1 }

</bundles_post_ra>
